<compile_context>
chip_gen: v5e
topology: v5e:2x2
jax: 0.10.0
libtpu: 0.0.40
codegen_flags: <defaults>
</compile_context>

<pallas_src>
import jax
import jax.numpy as jnp
from jax.experimental import pallas as pl
from jax.experimental.pallas import tpu as pltpu


C_PART = 16              # channels per input branch (4 branches -> 64 total)
TILE_HW_DEFAULT = 2048   # lane tile over flattened pixels (multiple of 128)


def _fuse_kernel(x1_ref, x2_ref, x3_ref, x4_ref,
                 w1_ref, w2_ref, w3_ref, w4_ref,
                 b_ref, o_ref):
    # x*_ref: (16, TILE)   w*_ref: (1, 16)   b_ref: (1,) in SMEM
    # o_ref : (1, 1, TILE)
    acc = jnp.dot(w1_ref[...], x1_ref[...], preferred_element_type=jnp.float32)
    acc += jnp.dot(w2_ref[...], x2_ref[...], preferred_element_type=jnp.float32)
    acc += jnp.dot(w3_ref[...], x3_ref[...], preferred_element_type=jnp.float32)
    acc += jnp.dot(w4_ref[...], x4_ref[...], preferred_element_type=jnp.float32)
    o_ref[0] = (acc + b_ref[0]).astype(o_ref.dtype)   # (1, TILE) lane-dense store


def concat_fuse_block(x1, x2, x3, x4, weight, bias, *, tile_hw=TILE_HW_DEFAULT):
    """x1..x4: (N, 16, H, W) float32 NCHW. weight: (1, 64, 1, 1). bias: (1,)."""
    n, c, h, w = x1.shape
    hw = h * w
    c_in = 4 * c
    assert weight.size == c_in, (weight.shape, c_in)

    # Free, contiguous reshapes: (N, 16, H, W) -> (N*16, H*W).
    # No concat, no transpose, no extra HBM pass.
    xs = [jnp.reshape(x, (n * c, hw)) for x in (x1, x2, x3, x4)]

    # Lane tile: multiple of 128, capped at the lane-padded pixel count.
    hw_pad = pl.cdiv(hw, 128) * 128
    tile = min(tile_hw, hw_pad)
    grid_j = pl.cdiv(hw, tile)        # tail tile handled by Pallas masking

    # Conv weight (1, 64, 1, 1) -> four (1, 16) row vectors matching x1..x4
    # (concat order along channels).  No in-kernel transpose / slicing needed.
    w_flat = weight.reshape(1, c_in).astype(jnp.float32)
    w_parts = [w_flat[:, i * c:(i + 1) * c] for i in range(4)]
    b_smem = bias.reshape(1).astype(jnp.float32)

    x_spec = pl.BlockSpec((c, tile), lambda i, j: (i, j))       # (16, TILE)
    w_spec = pl.BlockSpec((1, c), lambda i, j: (0, 0))          # grid-invariant
    b_spec = pl.BlockSpec(memory_space=pltpu.MemorySpace.SMEM)  # scalar bias

    out = pl.pallas_call(
        _fuse_kernel,
        out_shape=jax.ShapeDtypeStruct((n, 1, hw), jnp.float32),
        grid_spec=pltpu.PrefetchScalarGridSpec(
            num_scalar_prefetch=0,
            grid=(n, grid_j),
            in_specs=[x_spec] * 4 + [w_spec] * 4 + [b_spec],
            out_specs=pl.BlockSpec((1, 1, tile), lambda i, j: (i, 0, j)),
        ),
        compiler_params=pltpu.CompilerParams(
            dimension_semantics=("parallel", "parallel")),
    )(*xs, *w_parts, b_smem)

    # Free reshape back to NCHW: (N, 1, HW) -> (N, 1, H, W).
    return out.reshape(n, 1, h, w)


if __name__ == "__main__":
    key = jax.random.PRNGKey(0)
    k1, k2, k3, k4, kw, kb = jax.random.split(key, 6)

    N, Cpart, H, W = 2, 16, 16, 16
    x1 = jax.random.normal(k1, (N, Cpart, H, W), jnp.float32)
    x2 = jax.random.normal(k2, (N, Cpart, H, W), jnp.float32)
    x3 = jax.random.normal(k3, (N, Cpart, H, W), jnp.float32)
    x4 = jax.random.normal(k4, (N, Cpart, H, W), jnp.float32)

    # Deterministic parameter init (Conv2d(64, 1, 1) shapes), not a checkpoint.
    weight = jax.random.normal(kw, (1, 4 * Cpart, 1, 1), jnp.float32) * 0.05
    bias = jax.random.normal(kb, (1,), jnp.float32) * 0.05

    y = concat_fuse_block(x1, x2, x3, x4, weight, bias)
    y = jax.block_until_ready(y)

    # Reference check in plain JAX (1x1 conv == einsum over channels).
    x_cat = jnp.concatenate([x1, x2, x3, x4], axis=1)
    y_ref = (jnp.einsum("nchw,oc->nohw", x_cat, weight.reshape(1, 4 * Cpart))
             + bias.reshape(1, 1, 1, 1))

    assert y.shape == (N, 1, H, W), y.shape
    assert jnp.allclose(y, y_ref, atol=1e-4, rtol=1e-4), float(jnp.max(jnp.abs(y - y_ref)))
    print("KERNEL_OK")
</pallas_src>

<mosaic_0001>
module attributes {stable_mosaic.version = 11 : i64} {
  func.func @_fuse_kernel(%arg0: i32, %arg1: i32, %arg2: memref<16x256xf32, #tpu.memory_space<vmem>>, %arg3: memref<16x256xf32, #tpu.memory_space<vmem>>, %arg4: memref<16x256xf32, #tpu.memory_space<vmem>>, %arg5: memref<16x256xf32, #tpu.memory_space<vmem>>, %arg6: memref<1x16xf32, #tpu.memory_space<vmem>>, %arg7: memref<1x16xf32, #tpu.memory_space<vmem>>, %arg8: memref<1x16xf32, #tpu.memory_space<vmem>>, %arg9: memref<1x16xf32, #tpu.memory_space<vmem>>, %arg10: memref<1xf32, #tpu.memory_space<smem>>, %arg11: memref<1x1x256xf32, #tpu.memory_space<vmem>>) attributes {dimension_semantics = [#tpu.dimension_semantics<parallel>, #tpu.dimension_semantics<parallel>], iteration_bounds = array<i64: 2, 1>, scalar_prefetch = 0 : i64, scratch_operands = 0 : i64, tpu.core_type = #tpu.core_type<tc>, window_params = [{transform_indices = @transform_0, window_bounds = array<i64: 16, 256>}, {transform_indices = @transform_1, window_bounds = array<i64: 16, 256>}, {transform_indices = @transform_2, window_bounds = array<i64: 16, 256>}, {transform_indices = @transform_3, window_bounds = array<i64: 16, 256>}, {pipeline_mode = #tpu.pipeline_mode<synchronous>, transform_indices = @transform_4, window_bounds = array<i64: 1, 16>}, {pipeline_mode = #tpu.pipeline_mode<synchronous>, transform_indices = @transform_5, window_bounds = array<i64: 1, 16>}, {pipeline_mode = #tpu.pipeline_mode<synchronous>, transform_indices = @transform_6, window_bounds = array<i64: 1, 16>}, {pipeline_mode = #tpu.pipeline_mode<synchronous>, transform_indices = @transform_7, window_bounds = array<i64: 1, 16>}, {transform_indices = @transform_8, window_bounds = array<i64: 1>}, {transform_indices = @transform_9, window_bounds = array<i64: 1, 1, 256>}]} {
    %c0 = arith.constant 0 : index
    %c0_0 = arith.constant 0 : index
    %0 = vector.load %arg6[%c0, %c0_0] : memref<1x16xf32, #tpu.memory_space<vmem>>, vector<1x16xf32>
    %c0_1 = arith.constant 0 : index
    %c0_2 = arith.constant 0 : index
    %1 = vector.load %arg2[%c0_1, %c0_2] : memref<16x256xf32, #tpu.memory_space<vmem>>, vector<16x256xf32>
    %cst = arith.constant dense<0.000000e+00> : vector<1x256xf32>
    %2 = tpu.matmul %0, %1, %cst {dimension_numbers = #tpu.dot_dimension_numbers<[1], [0], [0], [1], [0, 0, 1, 1], [], []>} : vector<1x16xf32>, vector<16x256xf32>, vector<1x256xf32> -> vector<1x256xf32>
    %c0_3 = arith.constant 0 : index
    %c0_4 = arith.constant 0 : index
    %3 = vector.load %arg7[%c0_3, %c0_4] : memref<1x16xf32, #tpu.memory_space<vmem>>, vector<1x16xf32>
    %c0_5 = arith.constant 0 : index
    %c0_6 = arith.constant 0 : index
    %4 = vector.load %arg3[%c0_5, %c0_6] : memref<16x256xf32, #tpu.memory_space<vmem>>, vector<16x256xf32>
    %cst_7 = arith.constant dense<0.000000e+00> : vector<1x256xf32>
    %5 = tpu.matmul %3, %4, %cst_7 {dimension_numbers = #tpu.dot_dimension_numbers<[1], [0], [0], [1], [0, 0, 1, 1], [], []>} : vector<1x16xf32>, vector<16x256xf32>, vector<1x256xf32> -> vector<1x256xf32>
    %6 = arith.addf %2, %5 : vector<1x256xf32>
    %c0_8 = arith.constant 0 : index
    %c0_9 = arith.constant 0 : index
    %7 = vector.load %arg8[%c0_8, %c0_9] : memref<1x16xf32, #tpu.memory_space<vmem>>, vector<1x16xf32>
    %c0_10 = arith.constant 0 : index
    %c0_11 = arith.constant 0 : index
    %8 = vector.load %arg4[%c0_10, %c0_11] : memref<16x256xf32, #tpu.memory_space<vmem>>, vector<16x256xf32>
    %cst_12 = arith.constant dense<0.000000e+00> : vector<1x256xf32>
    %9 = tpu.matmul %7, %8, %cst_12 {dimension_numbers = #tpu.dot_dimension_numbers<[1], [0], [0], [1], [0, 0, 1, 1], [], []>} : vector<1x16xf32>, vector<16x256xf32>, vector<1x256xf32> -> vector<1x256xf32>
    %10 = arith.addf %6, %9 : vector<1x256xf32>
    %c0_13 = arith.constant 0 : index
    %c0_14 = arith.constant 0 : index
    %11 = vector.load %arg9[%c0_13, %c0_14] : memref<1x16xf32, #tpu.memory_space<vmem>>, vector<1x16xf32>
    %c0_15 = arith.constant 0 : index
    %c0_16 = arith.constant 0 : index
    %12 = vector.load %arg5[%c0_15, %c0_16] : memref<16x256xf32, #tpu.memory_space<vmem>>, vector<16x256xf32>
    %cst_17 = arith.constant dense<0.000000e+00> : vector<1x256xf32>
    %13 = tpu.matmul %11, %12, %cst_17 {dimension_numbers = #tpu.dot_dimension_numbers<[1], [0], [0], [1], [0, 0, 1, 1], [], []>} : vector<1x16xf32>, vector<16x256xf32>, vector<1x256xf32> -> vector<1x256xf32>
    %14 = arith.addf %10, %13 : vector<1x256xf32>
    %c0_18 = arith.constant 0 : index
    %15 = memref.load %arg10[%c0_18] : memref<1xf32, #tpu.memory_space<smem>>
    %16 = vector.broadcast %15 : f32 to vector<1x256xf32>
    %17 = arith.addf %14, %16 : vector<1x256xf32>
    %c0_19 = arith.constant 0 : index
    %c0_20 = arith.constant 0 : index
    %c0_21 = arith.constant 0 : index
    %18 = vector.load %arg11[%c0_19, %c0_20, %c0_21] : memref<1x1x256xf32, #tpu.memory_space<vmem>>, vector<1x1x256xf32>
    %19 = vector.shape_cast %18 : vector<1x1x256xf32> to vector<1x256xf32>
    %20 = vector.shape_cast %17 : vector<1x256xf32> to vector<1x1x256xf32>
    tpu.vector_store %arg11[%c0_19, %c0_20, %c0_21], %20 {strides = array<i32>} : memref<1x1x256xf32, #tpu.memory_space<vmem>>, vector<1x1x256xf32>,
    return
  }
  func.func @transform_0(%arg0: i32, %arg1: i32) -> (i32, i32) {
    %c0_i32 = arith.constant 0 : i32
    return %arg0, %arg1 : i32, i32
  }
  func.func @transform_1(%arg0: i32, %arg1: i32) -> (i32, i32) {
    %c0_i32 = arith.constant 0 : i32
    return %arg0, %arg1 : i32, i32
  }
  func.func @transform_2(%arg0: i32, %arg1: i32) -> (i32, i32) {
    %c0_i32 = arith.constant 0 : i32
    return %arg0, %arg1 : i32, i32
  }
  func.func @transform_3(%arg0: i32, %arg1: i32) -> (i32, i32) {
    %c0_i32 = arith.constant 0 : i32
    return %arg0, %arg1 : i32, i32
  }
  func.func @transform_4(%arg0: i32, %arg1: i32) -> (i32, i32) {
    %c0_i32 = arith.constant 0 : i32
    %c0_i32_0 = arith.constant 0 : i32
    %c0_i32_1 = arith.constant 0 : i32
    return %c0_i32, %c0_i32_0 : i32, i32
  }
  func.func @transform_5(%arg0: i32, %arg1: i32) -> (i32, i32) {
    %c0_i32 = arith.constant 0 : i32
    %c0_i32_0 = arith.constant 0 : i32
    %c0_i32_1 = arith.constant 0 : i32
    return %c0_i32, %c0_i32_0 : i32, i32
  }
  func.func @transform_6(%arg0: i32, %arg1: i32) -> (i32, i32) {
    %c0_i32 = arith.constant 0 : i32
    %c0_i32_0 = arith.constant 0 : i32
    %c0_i32_1 = arith.constant 0 : i32
    return %c0_i32, %c0_i32_0 : i32, i32
  }
  func.func @transform_7(%arg0: i32, %arg1: i32) -> (i32, i32) {
    %c0_i32 = arith.constant 0 : i32
    %c0_i32_0 = arith.constant 0 : i32
    %c0_i32_1 = arith.constant 0 : i32
    return %c0_i32, %c0_i32_0 : i32, i32
  }
  func.func @transform_8(%arg0: i32, %arg1: i32) -> i32 {
    %c0_i32 = arith.constant 0 : i32
    %c0_i32_0 = arith.constant 0 : i32
    return %c0_i32 : i32
  }
  func.func @transform_9(%arg0: i32, %arg1: i32) -> (i32, i32, i32) {
    %c0_i32 = arith.constant 0 : i32
    %c0_i32_0 = arith.constant 0 : i32
    return %arg0, %c0_i32, %arg1 : i32, i32, i32
  }
}

</mosaic_0001>

<bundles_post_ra>
// kernel: tpu_custom_call.1
= control target key start
LH: loop header
LB: loop body
LE: loop exit
PB: predicated region body
PF: predicated region fallthrough
CT: control target
= control target key end

     0   :  { %s1524_s0 = inlined_call_operand.hbm [shape: f32[32,256], index: 0, kind: input, shape index: {}]   ;;  %s1525_s1 = inlined_call_operand.hbm [shape: f32[32,256], index: 1, kind: input, shape index: {}]   ;;  %s1526_s2 = inlined_call_operand.hbm [shape: f32[32,256], index: 2, kind: input, shape index: {}]   ;;  %s1527_s3 = inlined_call_operand.hbm [shape: f32[32,256], index: 3, kind: input, shape index: {}]   ;;  %s1528_s4 = inlined_call_operand.vmem [shape: f32[1,16], index: 4, kind: input, shape index: {}]   ;;  %s1529_s5 = inlined_call_operand.vmem [shape: f32[1,16], index: 5, kind: input, shape index: {}]   ;;  %s1530_s6 = inlined_call_operand.vmem [shape: f32[1,16], index: 6, kind: input, shape index: {}]   ;;  %s1531_s7 = inlined_call_operand.vmem [shape: f32[1,16], index: 7, kind: input, shape index: {}]   ;;  %s1532_s8 = inlined_call_operand.<no memory space> [shape: f32[1], index: 8, kind: input, shape index: {}]   ;;  %s1533_s9 = inlined_call_operand.hbm [shape: f32[2,1,256], index: 9, kind: output, shape index: {}]  }
   0x1   :  { %1544 = sst [smem:[#allocation24_spill]] %s1524_s0 }
   0x2   :  { %1545 = sst [smem:[#allocation25_spill]] %s1525_s1 }
   0x3   :  { %1546 = sst [smem:[#allocation26_spill]] %s1533_s9 }
   0x4   :  { %14 = sst [smem:[#allocation2]] %s1532_s8 }
   0x5   :  { %15 = vsyncpa [#allocation4], 0 }
   0x6   :  { %17 = vsyncpa [#allocation4 + $0x1], 0 }
   0x7   :  { %18 = vsyncpa [#allocation7], 0 }
   0x8   :  { %20 = vsyncpa [#allocation7 + $0x1], 0 }
   0x9   :  { %21 = vsyncpa [#allocation10], 0 }
   0xa   :  { %23 = vsyncpa [#allocation10 + $0x1], 0 }
   0xb   :  { %24 = vsyncpa [#allocation5], 0 }
   0xc   :  { %26 = vsyncpa [#allocation5 + $0x1], 0  ;;  %s1300_s11 = smov 0   ;;  %s1302_s12 = smov 0  }
   0xd   :  { %s1304_s13 = smov 0   ;;  %s1306_s14 = smov 0  }
   0xe   :  { %s1308_s15 = smov 0   ;;  %s1310_s16 = smov 0  }
   0xf LB: > { %1547 = sst [smem:[#allocation16_spill]] %s1223_s11  ;;  %s1331_s8 = sadd.s32 4294967295, %s1243_s16   ;;  %s1243_s16 = sphi %s1310_s16, %s32_s16   ;;  %s1239_s15 = sphi %s1308_s15, %s1572_s15   ;;  %s1235_s14 = sphi %s1306_s14, %s1571_s14   ;;  %s1231_s13 = sphi %s1304_s13, %s1570_s13   ;;  %s1227_s12 = sphi %s1302_s12, %s1574_s12   ;;  %s1223_s11 = sphi %s1300_s11, %s1573_s11  }
  0x10   : > { %1548 = sst [smem:[#allocation17_spill]] %s1231_s13  ;;  %s909_s17 = sadd.s32 4294967294, %s1243_s16  }
  0x11   : > { %1549 = sst [smem:[#allocation18_spill]] %s1239_s15  ;;  %s44_s18 = sadd.s32 1, %s1239_s15 }
  0x12   : > { %1550 = sst [smem:[#allocation19_spill]] %s1243_s16  ;;  %s53_s19 = sadd.s32 1, %s1231_s13 }
  0x13   : > { %p46_p0 = scmp.ge.s32.totalorder %s44_s18, 2  ;;  %p60_p1 = scmp.ne.s32.totalorder %s1231_s13, %s1227_s12 }
  0x14   : > { %p61_p2 = scmp.eq.s32.totalorder %s1243_s16, 0  ;;  %p66_p3 = scmp.ne.s32.totalorder %s1227_s12, %s1223_s11 }
  0x15   : > { %s1576_s18 = smov (%p46_p0, %s44_s18), 0  ;;  %p67_p5 = scmp.eq.s32.totalorder %s1331_s8, 0 }
  0x16   : > { %1551 = sst [smem:[#allocation20_spill]] %s1576_s18  ;;  %p1343_p4 = por %p61_p2, %p60_p1 }
  0x17   : > { %s48_s21 = ssub.s32 %s1239_s15, %s1576_s18  ;;  %p281_p6 = scmp.eq.s32.totalorder %s1331_s8, 1 }
  0x18   : > { %p51_p7 = scmp.eq.s32.totalorder %s48_s21, 0  ;;  %p1351_p8 = por %p67_p5, %p66_p3 }
  0x19   : > { %p1355_p9 = por %p281_p6, %p60_p1  ;;  %p287_p10 = scmp.eq.s32.totalorder %s909_s17, 1 }
  0x1a   : > { %s1360_s24 = scalar_select %p51_p7, %s1231_s13, %s53_s19  }
  0x1b   : > { %s1554_s23 = scalar_select %p1355_p9, 1, 0 }
  0x1c   : > { %1556 = sst [smem:[#allocation22_spill]] %s1360_s24  ;;  %p1362_p11 = por %p287_p10, %p66_p3 }
  0x1d   : > { %1555 = sst [smem:[#allocation21_spill]] %s1554_s23  ;;  %p911_p12 = scmp.ge.s32.totalorder %s1243_s16, 2 }
  0x1e   : > { %s1557_s25 = scalar_select %p1362_p11, 1, 0 }
  0x1f   : > { %p981_p13 = scmp.lt.s32.totalorder %s1243_s16, 2  ;;  %s1369_s26 = sand.u32 1, %s1231_s13  }
  0x20   : > { %1558 = sst [smem:[#allocation23_spill]] %s1557_s25  ;;  %s1372_s27 = sshll.u32 %s1369_s26, 5 }
  0x21   : > { %s1375_s28 = sshll.u32 %s1239_s15, 5  ;;  %p1379_p0 = pnand %p981_p13, %p1343_p4 }
  0x22   : > { %s347_s30 = sand.u32 1, %s1243_s16   ;;  %s1560_s1 = sld [smem:[#allocation25_spill]] }
  0x23   : > { %s351_s18 = scalar_lea.vmem [#allocation6], %s1372_s27  ;;  %s348_s20 = scalar_lea.sflag [#allocation7], %s347_s30 }
  0x24   : > { %s362_s24 = sshll.u32 %s351_s18, 4  ;;  %s1245_s15 = smov 256   ;;  %s363_s24 = int_to_ptr.vmem [resolvable:$true] %s362_s24 }
  0x25   : > { %s1246_s13 = smov 16   ;;  %p928_p1 = scmp.ge.s32.totalorder %s1243_s16, 1 }
  0x26   : > { %p420_p2 = scmp.lt.s32.totalorder %s1243_s16, 3  ;;  %s1562_s0 = sld [smem:[#allocation24_spill]] }
  0x27   : > { %s384_s18 = scalar_lea.hbm %s1526_s2, %s1375_s28  ;;  %s409_s23 = scalar_lea.hbm %s1527_s3, %s1375_s28 }
  0x28   : > { %s359_s19 = scalar_lea.hbm %s1560_s1, %s1375_s28  ;;  %p1396_p3 = pnand %p928_p1, %p420_p2 }
  0x29   : > { %s360_s21 = sshll.u32 %s359_s19, 4  ;;  %s326_s1 = scalar_lea.vmem [#allocation3], %s1372_s27  ;;  %s361_s21 = int_to_ptr.hbm [resolvable:$true] %s360_s21 }
  0x2a   : > { %970 = dma.hbm_to_vmem [thread:$0]  (!%p1379_p0), %s361_s21, 512, %s363_s24, %s348_s20, %s1245_s15, %s1245_s15, %s1246_s13  }
  0x2b   : > { %s337_s25 = sshll.u32 %s326_s1, 4  ;;  %s323_s24 = scalar_lea.sflag [#allocation4], %s1369_s26  ;;  %s338_s25 = int_to_ptr.vmem [resolvable:$true] %s337_s25 }
  0x2c   : > { %s334_s30 = scalar_lea.hbm %s1562_s0, %s1375_s28  ;;  %s385_s17 = sshll.u32 %s384_s18, 4  ;;  %s386_s17 = int_to_ptr.hbm [resolvable:$true] %s385_s17 }
  0x2d   : > { %s335_s19 = sshll.u32 %s334_s30, 4  ;;  %s376_s0 = scalar_lea.vmem [#allocation8], %s1372_s27  ;;  %s336_s19 = int_to_ptr.hbm [resolvable:$true] %s335_s19 }
  0x2e   : > { %967 = dma.hbm_to_vmem [thread:$0]  (!%p1379_p0), %s336_s19, 512, %s338_s25, %s323_s24, %s1245_s15, %s1245_s15, %s1246_s13  }
  0x2f   : > { %s387_s11 = sshll.u32 %s376_s0, 4  ;;  %s401_s9 = scalar_lea.vmem [#allocation9], %s1372_s27  ;;  %s388_s11 = int_to_ptr.vmem [resolvable:$true] %s387_s11 }
  0x30   : > { %973 = dma.hbm_to_vmem [thread:$0]  (!%p1379_p0), %s386_s17, 512, %s388_s11, %s348_s20, %s1245_s15, %s1245_s15, %s1246_s13  }
  0x31   : > { %s412_s25 = sshll.u32 %s401_s9, 4  ;;  %s410_s19 = sshll.u32 %s409_s23, 4  ;;  %s413_s25 = int_to_ptr.vmem [resolvable:$true] %s412_s25  ;;  %s411_s19 = int_to_ptr.hbm [resolvable:$true] %s410_s19 }
  0x32   : > { %s398_s16 = scalar_lea.sflag [#allocation10], %s1369_s26  ;;  %424 = sbr.rel (%p1396_p3) target bundleno = 218 (0xda), region = 56 }
  0x33   : > { %976 = dma.hbm_to_vmem [thread:$0]  (!%p1379_p0), %s411_s19, 512, %s413_s25, %s398_s16, %s1245_s15, %s1245_s15, %s1246_s13  }
  0x34   : > { %s1435_s0 = sand.u32 (!%p1396_p3), 1, %s1227_s12  }
  0x35   : > { %s929_s11 = sshll.u32 (!%p1396_p3), %s1435_s0, 5  ;;  %s427_s9 = scalar_lea.sflag (!%p1396_p3), [#allocation4], %s1435_s0 }
  0x36   : > { %s430_s23 = scalar_lea.vmem (!%p1396_p3), [#allocation3], %s929_s11 }
  0x37   : > { %1206 = dma.done.wait (%p1351_p8), %s427_s9, 512  }
  0x38   : > { %1208 = vsyncadd (%p1351_p8), %s427_s9, 4294966784  ;;  %s436_s13 = sand.u32 1, %s1331_s8   ;;  %s440_s26 = scalar_lea.vmem [#allocation6], %s929_s11 }
  0x39   : > { %s437_s15 = scalar_lea.sflag [#allocation7], %s436_s13 }
  0x3a   : > { %1210 = dma.done.wait (%p1351_p8), %s437_s15, 1024  }
  0x3b   : > { %1212 = vsyncadd (%p1351_p8), %s437_s15, 4294966272  ;;  %s1448_s27 = scalar_lea.vmem [#allocation8], %s929_s11  ;;  %s457_s28 = scalar_lea.sflag [#allocation10], %s1435_s0 }
  0x3c   : > { %s1451_s29 = scalar_lea.vmem [#allocation9], %s929_s11 }
  0x3d   : > { %1214 = dma.done.wait (%p1351_p8), %s457_s28, 512  }
  0x3e   : > { %1216 = vsyncadd (%p1351_p8), %s457_s28, 4294966784  ;;  %v528_v0 = vld [vmem:[%s440_s26 + $0x10] sm:$0xff]  ;;  %v529_v1 = vld [vmem:[%s440_s26 + $0x18] sm:$0xff]  ;;  %vm530_vm0 = vcmask 130048   ;;  %s717_s1 = sld [smem:[#allocation2]]  ;;  %s933_s30 = sshll.u32 %s1435_s0, 1  ;;  %v727_v35 = vlaneseq }
  0x3f   : > { %v523_v2 = vld [vmem:[%s430_s23 + $0x10] sm:$0xff]  ;;  %548 = vmatpush.msra.mxu0 %v528_v0  ;;  %568 = vmatpush.msra.mxu1 %v529_v1  ;;  %v524_v3 = vld [vmem:[%s430_s23 + $0x18] sm:$0xff]  ;;  %v526_v4 = vld [vmem:[%s440_s26] sm:$0xff]  ;;  %s943_s25 = sshll.u32 %s1235_s14, 1  ;;  %s1563_s11 = sld [smem:[#allocation26_spill]]  ;;  %vm724_vm1 = vcmask 1040384  }
  0x40   : > { %v527_v5 = vld [vmem:[%s440_s26 + $0x8] sm:$0xff]  ;;  %591 = vmatpush.msra.mxu2 %v523_v2  ;;  %611 = vmatpush.msra.mxu3 %v524_v3  ;;  %v521_v6 = vld [vmem:[%s430_s23] sm:$0xff]  ;;  %v671_v10 = vld [vmem:[%s1451_s29 + $0x18] sm:$0xff]  ;;  %s510_s13 = scalar_lea.vmem [#allocation11], %s933_s30  ;;  %vm729_vm2 = vcmp.lt.s32.totalorder %v727_v35, 256  ;;  %s733_s14 = scalar_lea.sflag [#allocation5], %s1435_s0 }
  0x41   : > { %v522_v7 = vld [vmem:[%s430_s23 + $0x8] sm:$0xff]  ;;  %v525_v8 = vld [vmem:[%s1529_s5] sm:$0x1]  ;;  %549 = vmatpush.msra.mxu0 %v526_v4  ;;  %569 = vmatpush.msra.mxu1 %v527_v5  ;;  %v670_v11 = vld [vmem:[%s1451_s29 + $0x10] sm:$0xff]  ;;  %s747_s26 = sshll.u32 %s510_s13, 4  ;;  %s748_s26 = int_to_ptr.vmem [resolvable:$true] %s747_s26 }
  0x42   : > { %v520_v9 = vld [vmem:[%s1528_s4] sm:$0x1]  ;;  %592 = vmatpush.msra.mxu2 %v521_v6  ;;  %612 = vmatpush.msra.mxu3 %v522_v7  ;;  %v621_v12 = vld [vmem:[%s1448_s27 + $0x18] sm:$0xff]  ;;  %v620_v13 = vld [vmem:[%s1448_s27 + $0x10] sm:$0xff] }
  0x43   : > { %934 = vmatmul.msk.f32.vlgmr.msra.gmra.mxu0 %vm530_vm0, %v525_v8  ;;  %935 = vmatmul.msk.f32.vlgmr.msra.gmra.mxu1 %vm530_vm0, %v525_v8  ;;  %v669_v14 = vld [vmem:[%s1451_s29 + $0x8] sm:$0xff]  ;;  %v668_v15 = vld [vmem:[%s1451_s29] sm:$0xff] }
  0x44   : > { %936 = vmatmul.msk.f32.vlgmr.msra.gmra.mxu2 %vm530_vm0, %v520_v9  ;;  %937 = vmatmul.msk.f32.vlgmr.msra.gmra.mxu3 %vm530_vm0, %v520_v9  ;;  %v618_v16 = vld [vmem:[%s1448_s27] sm:$0xff]  ;;  %v619_v17 = vld [vmem:[%s1448_s27 + $0x8] sm:$0xff]  ;;  %v718_v31 = vstv %s717_s1 }
  0x45   : > { %709 = vmatpush.msrb.mxu3 %v671_v10  ;;  %689 = vmatpush.msrb.mxu2 %v670_v11  ;;  %v617_v18 = vld [vmem:[%s1530_s6] sm:$0x1]  ;;  %s1564_s9 = smov %s1563_s11  ;;  %s745_s23 = scalar_lea.hbm %s1563_s11, %s943_s25 }
  0x46   : > { %659 = vmatpush.msrb.mxu1 %v621_v12  ;;  %639 = vmatpush.msrb.mxu0 %v620_v13  ;;  %v667_v19 = vld [vmem:[%s1531_s7] sm:$0x1]  ;;  %s749_s27 = sshll.u32 %s745_s23, 4  ;;  %s1173_s22 = scalar_lea.hbm %s1564_s9, 4  ;;  %s750_s27 = int_to_ptr.hbm [resolvable:$true] %s749_s27 }
  0x47   : > { %710 = vmatpush.msrb.mxu3 %v669_v14  ;;  %690 = vmatpush.msrb.mxu2 %v668_v15  ;;  %s1167_s28 = sshra.s32 %s750_s27, 4  ;;  %s1168_s28 = int_to_ptr.hbm [resolvable:$true] %s1167_s28 }
  0x48   : > { %640 = vmatpush.msrb.mxu0 %v618_v16  ;;  %660 = vmatpush.msrb.mxu1 %v619_v17  ;;  %s1169_s29 = scalar_lea.hbm %s1168_s28, 2  ;;  %p1174_p7 = scmp.lt.s32.totalorder %s1168_s28, %s1564_s9 }
  0x49   : > { %p1170_p4 = scmp.ne.s32.totalorder %s1168_s28, %s1169_s29  ;;  %p1175_p8 = scmp.lt.s32.totalorder %s1173_s22, %s1169_s29 }
  0x4b   : > { %938 = vmatmul.msk.f32.vlgmr.msrb.gmra.mxu0 %vm530_vm0, %v617_v18  ;;  %939 = vmatmul.msk.f32.vlgmr.msrb.gmra.mxu1 %vm530_vm0, %v617_v18  ;;  %p1171_p5 = pnand %p1170_p4, %p1355_p9  ;;  %p1176_p10 = por %p1175_p8, %p1174_p7 }
  0x4c   : > { %940 = vmatmul.msk.f32.vlgmr.msrb.gmra.mxu2 %vm530_vm0, %v667_v19  ;;  %941 = vmatmul.msk.f32.vlgmr.msrb.gmra.mxu3 %vm530_vm0, %v667_v19 }
  0x4d   : > { %p1172_p6 = pneg %p1171_p5 }
  0x4f   : > { %p1177_p13 = pnand %p1176_p10, %p1172_p6 }
  0xc0   : > { %v551_v20 = vpop.f32.mrf.mxu0  ;;  %v571_v21 = vpop.f32.mrf.mxu1 }
  0xc7   : > { %v594_v22 = vpop.f32.mrf.mxu2  ;;  %v614_v23 = vpop.f32.mrf.mxu3 }
  0xc8   : > { %v595_v24 = vadd.f32 %v594_v22, %v551_v20  ;;  %v615_v25 = vadd.f32 %v614_v23, %v571_v21  ;;  %v642_v26 = vpop.f32.mrf.mxu0  ;;  %v662_v27 = vpop.f32.mrf.mxu1 }
  0xca   : > { %v665_v28 = vadd.f32 %v642_v26, %v595_v24  ;;  %v666_v29 = vadd.f32 %v662_v27, %v615_v25 }
  0xcf   : > { %v692_v30 = vpop.f32.mrf.mxu2  ;;  %v712_v32 = vpop.f32.mrf.mxu3 }
  0xd0   : > { %v715_v33 = vadd.f32 %v692_v30, %v665_v28  ;;  %v716_v34 = vadd.f32 %v712_v32, %v666_v29 }
  0xd2   : > { %v720_v36 = vadd.f32 %v718_v31, %v716_v34  ;;  %v719_v37 = vadd.f32 %v718_v31, %v715_v33 }
  0xd4   : > { %v723_v38 = vrot.slane %v720_v36, 7 }
  0xd6   : > { %v725_v39 = vsel %vm724_vm1, %v719_v37, %v723_v38 }
  0xd7   : > { %731 = vst.msk [vmem:[%s510_s13] sm:$0x3] %vm729_vm2, %v725_v39 }
  0xd8   : > { %1180 = shalt.err (!%p1177_p13)
}
  0xd9   : > { %962 = dma.vmem_to_hbm [thread:$0]  (%p1355_p9), %s748_s26, 32, %s750_s27, %s733_s14  }
  0xda PF: > { %s1566_s0 = sld [smem:[#allocation16_spill]]  ;;  %p978_p0 = pnand %p911_p12, %p1362_p11 }
  0xdb   : > { %s1568_s18 = sld [smem:[#allocation19_spill]] }
  0xdc   : > { %p979_p1 = pneg %p978_p0 }
  0xe0   : > { %s761_s17 = sand.u32 1, %s1566_s0  }
  0xe1   : > { %s762_s1 = scalar_lea.sflag [#allocation5], %s761_s17 }
  0xe2   : > { %1218 = dma.done.wait (%p979_p1), %s762_s1, 32  }
  0xe3   : > { %1220 = vsyncadd (%p979_p1), %s762_s1, 4294967264  ;;  %s32_s16 = sadd.s32 1, %s1568_s18   ;;  %s1569_s30 = sld [smem:[#allocation17_spill]] }
  0xe4   : > { %p29_p2 = scmp.ge.s32.totalorder %s32_s16, 4   ;;  %s1570_s13 = sld [smem:[#allocation22_spill]] }
  0xe5   : > { %s1571_s14 = sld [smem:[#allocation18_spill]]  ;;  %s1573_s11 = smov %s1227_s12 }
  0xe6   : > { %s1572_s15 = sld [smem:[#allocation20_spill]]  ;;  %31 = sbr.rel (!%p29_p2) target bundleno = 15 (0xf), region = 138 }
  0xe9   : > { %s1574_s12 = smov %s1569_s30 }
  0xeb   :  { %768 = vsyncpa [#allocation4], 1 }
  0xec   :  { %770 = vsyncpa [#allocation4 + $0x1], 1 }
  0xed   :  { %771 = vsyncpa [#allocation7], 1 }
  0xee   :  { %773 = vsyncpa [#allocation7 + $0x1], 1 }
  0xef   :  { %774 = vsyncpa [#allocation10], 1 }
  0xf0   :  { %776 = vsyncpa [#allocation10 + $0x1], 1 }
  0xf1   :  { %777 = vsyncpa [#allocation5], 1 }
  0xf2   :  { %779 = vsyncpa [#allocation5 + $0x1], 1 }

</bundles_post_ra>
